<compile_context>
chip_gen: v5e
topology: v5e:2x2
jax: 0.10.0
libtpu: 0.0.40
codegen_flags: <defaults>
</compile_context>

<pallas_src>
import jax
import jax.numpy as jnp
from jax.experimental import pallas as pl
from jax.experimental.pallas import tpu as pltpu

LEAKY_SLOPE = 0.2
_LPAD = 8                                  # left sublane pad -> aligned interior stores
_BLUR_W = (1.0, 2.0, 1.0)                  # binomial blur taps (normalised by 16)
_BLUR_1D = jnp.array(_BLUR_W, jnp.float32)  # for the pure-JAX reference only


# --------------------------- in-kernel helpers ------------------------------

def _leaky(x):
    return jnp.where(x >= 0.0, x, LEAKY_SLOPE * x)


def _conv3x3_from_halo(p_ref, w_ref, H, W, Cin, Cout):
    """3x3 conv (pad=1) as 9 shifted bf16 MXU dots with f32 accumulation.

    p_ref holds a zero-padded image: interior rows [1, H], cols [_LPAD, _LPAD+W).
    w_ref: (9, Cin, Cout) bf16, WS-scale already folded in.
    """
    acc = jnp.zeros((H * W, Cout), jnp.float32)
    for t in range(9):
        dy, dx = divmod(t, 3)
        xs = p_ref[dy:dy + H, _LPAD - 1 + dx:_LPAD - 1 + dx + W, :]
        acc = acc + jnp.dot(xs.reshape(H * W, Cin).astype(jnp.bfloat16),
                            w_ref[t], preferred_element_type=jnp.float32)
    return acc


def _store_pooled_cols(s_ref, o_ref, Wo):
    """Final half of the 2x2 average pool (column-pair sums), pure VPU.

    s_ref: (Ho, W, C) row-pair sums; writes 0.25 * column-pair sums into the
    (1, Ho, Wo, C) output block.
    """
    if Wo <= 32:
        # Unrolled static sublane indices -- safe for the small widths used here.
        for j in range(Wo):
            o_ref[0, :, j, :] = 0.25 * (s_ref[:, 2 * j, :] + s_ref[:, 2 * j + 1, :])
    else:
        # TODO(synk): large widths use a sublane-strided read instead of unrolling.
        o_ref[0] = 0.25 * (s_ref[:, pl.ds(0, Wo, 2), :] +
                           s_ref[:, pl.ds(1, Wo, 2), :])


# ------------------------------ Pallas kernels ------------------------------

def _disc_block_kernel(x_ref, w1_ref, b1_ref, w2_ref, b2_ref, o_ref, p_ref, s_ref):
    """Fused DiscriminatorBlock: conv1+LReLU -> blur -> conv2+LReLU -> avgpool2.

    One image per grid step; every intermediate lives in VMEM (p_ref halo
    scratch is reused for all three padded stages -- conv1 in/out and blur out).
    """
    _, H, W, Cin = x_ref.shape
    Cout = o_ref.shape[3]
    Ho, Wo = H // 2, W // 2
    L = _LPAD

    def write_interior(val_hwc):
        p_ref[1:H + 1, L:L + W, :] = val_hwc

    # zero halo ring once per step; interior is fully overwritten each stage
    p_ref[...] = jnp.zeros_like(p_ref)
    write_interior(x_ref[0])

    # conv1 (3x3, pad 1) + LeakyReLU
    y1 = _leaky(_conv3x3_from_halo(p_ref, w1_ref, H, W, Cin, Cin) + b1_ref[...])
    write_interior(y1.reshape(H, W, Cin))

    # depthwise 3x3 binomial blur ([1,2,1] x [1,2,1] / 16) -- VPU shift-adds
    blur = jnp.zeros((H, W, Cin), jnp.float32)
    for t in range(9):
        dy, dx = divmod(t, 3)
        c = _BLUR_W[dy] * _BLUR_W[dx] / 16.0
        blur = blur + c * p_ref[dy:dy + H, L - 1 + dx:L - 1 + dx + W, :]
    write_interior(blur)

    # conv2 (3x3, pad 1) + LeakyReLU
    y2 = _leaky(_conv3x3_from_halo(p_ref, w2_ref, H, W, Cin, Cout) + b2_ref[...])

    # 2x2 average pool: rows via leading-dim reshape, cols via pair sums
    rows = y2.reshape(Ho, 2, W, Cout)
    s_ref[...] = rows[:, 0] + rows[:, 1]
    _store_pooled_cols(s_ref, o_ref, Wo)


def _last_block_kernel(x_ref, w1_ref, b1_ref, w2_ref, b2_ref, w3_ref, b3_ref,
                       o_ref, xp_ref, y1_ref):
    """Fused LastDiscriminatorBlock: mbstd -> conv1(3x3) -> conv2(4x4) -> conv3."""
    N, H, W, C = x_ref.shape          # (N, 4, 4, 256)
    L = _LPAD

    # minibatch stddev (unbiased std over batch, mean over all features)
    x = x_ref[...]
    mean = jnp.mean(x, axis=0, keepdims=True)
    var = jnp.sum((x - mean) ** 2, axis=0) / (N - 1)
    stat = jnp.mean(jnp.sqrt(var))

    # zero-padded input with the appended stddev channel (channel index C)
    xp_ref[...] = jnp.zeros_like(xp_ref)
    xp_ref[:, 1:H + 1, L:L + W, :C] = x
    xp_ref[:, 1:H + 1, L:L + W, C:] = jnp.broadcast_to(stat, (N, H, W, 1))

    # conv1: 3x3, pad 1, (C+1) -> C, LeakyReLU  (4x4 spatial -> per-row dots)
    for n in range(N):
        for i in range(H):
            acc = jnp.zeros((W, C), jnp.float32)
            for t in range(9):
                dy, dx = divmod(t, 3)
                xs = xp_ref[n, i + dy, L - 1 + dx:L - 1 + dx + W, :]
                acc = acc + jnp.dot(xs.astype(jnp.bfloat16), w1_ref[t],
                                    preferred_element_type=jnp.float32)
            y1_ref[n, i] = _leaky(acc + b1_ref[...])

    # conv2: 4x4, pad 0 -> 1x1 spatial, LeakyReLU (batch rows feed the MXU)
    acc2 = jnp.zeros((N, C), jnp.float32)
    for t in range(H * W):
        i, j = divmod(t, W)
        acc2 = acc2 + jnp.dot(y1_ref[:, i, j, :].astype(jnp.bfloat16), w2_ref[t],
                              preferred_element_type=jnp.float32)
    y2 = _leaky(acc2 + b2_ref[...])

    # conv3: 1x1, C -> 1, no activation -- VPU row reduction (lane-dense math)
    o_ref[...] = jnp.sum(y2 * w3_ref[...], axis=1, keepdims=True) + b3_ref[...]


def _from_rgb_kernel(x_ref, w_ref, b_ref, o_ref):
    """WSConv2d 1x1 (3 -> C), no activation."""
    _, H, W, Cin = x_ref.shape
    Cout = w_ref.shape[1]
    x2 = x_ref[0].reshape(H * W, Cin).astype(jnp.bfloat16)
    y = jnp.dot(x2, w_ref[...], preferred_element_type=jnp.float32) + b_ref[...]
    o_ref[0] = y.reshape(H, W, Cout)


def _avg_pool_kernel(x_ref, o_ref, s_ref):
    """2x2 average pool of the raw RGB image (blend path), pure VPU."""
    _, H, W, C = x_ref.shape
    Ho, Wo = H // 2, W // 2
    rows = x_ref[0].reshape(Ho, 2, W, C)
    s_ref[...] = rows[:, 0] + rows[:, 1]
    _store_pooled_cols(s_ref, o_ref, Wo)


def _blend_kernel(alpha_ref, a_ref, b_ref, o_ref):
    a = alpha_ref[0]
    o_ref[...] = (1.0 - a) * a_ref[...] + a * b_ref[...]


# ------------------------------ call wrappers -------------------------------

def disc_block(x, bp):
    """x: (N, H, W, Cin) f32 -> (N, H//2, W//2, Cout) f32."""
    N, H, W, Cin = x.shape
    Cout = bp["conv2"]["cout"]
    Ho, Wo = H // 2, W // 2
    return pl.pallas_call(
        _disc_block_kernel,
        out_shape=jax.ShapeDtypeStruct((N, Ho, Wo, Cout), jnp.float32),
        grid=(N,),
        in_specs=[
            pl.BlockSpec((1, H, W, Cin), lambda n: (n, 0, 0, 0)),
            pl.BlockSpec((9, Cin, Cin), lambda n: (0, 0, 0)),
            pl.BlockSpec((1, Cin), lambda n: (0, 0)),
            pl.BlockSpec((9, Cin, Cout), lambda n: (0, 0, 0)),
            pl.BlockSpec((1, Cout), lambda n: (0, 0)),
        ],
        out_specs=pl.BlockSpec((1, Ho, Wo, Cout), lambda n: (n, 0, 0, 0)),
        scratch_shapes=[pltpu.VMEM((H + 2, W + 2 * _LPAD, Cin), jnp.float32),
                        pltpu.VMEM((Ho, W, Cout), jnp.float32)],
        compiler_params=pltpu.CompilerParams(dimension_semantics=("parallel",)),
    )(x, bp["conv1"]["w"], bp["conv1"]["b"], bp["conv2"]["w"], bp["conv2"]["b"])


def last_block(x, lp):
    """x: (N, 4, 4, 256) f32 -> (N, 1) f32 (whole batch in one invocation)."""
    N, H, W, C = x.shape
    return pl.pallas_call(
        _last_block_kernel,
        out_shape=jax.ShapeDtypeStruct((N, 1), jnp.float32),
        scratch_shapes=[
            pltpu.VMEM((N, H + 2, W + 2 * _LPAD, C + 1), jnp.float32),
            pltpu.VMEM((N, H, W, C), jnp.float32),
        ],
    )(x, lp["conv1"]["w"], lp["conv1"]["b"], lp["conv2"]["w"], lp["conv2"]["b"],
      lp["w3"], lp["b3"])


def from_rgb(x, fp):
    N, H, W, Cin = x.shape
    Cout = fp["cout"]
    return pl.pallas_call(
        _from_rgb_kernel,
        out_shape=jax.ShapeDtypeStruct((N, H, W, Cout), jnp.float32),
        grid=(N,),
        in_specs=[
            pl.BlockSpec((1, H, W, Cin), lambda n: (n, 0, 0, 0)),
            pl.BlockSpec((Cin, Cout), lambda n: (0, 0)),
            pl.BlockSpec((1, Cout), lambda n: (0, 0)),
        ],
        out_specs=pl.BlockSpec((1, H, W, Cout), lambda n: (n, 0, 0, 0)),
        compiler_params=pltpu.CompilerParams(dimension_semantics=("parallel",)),
    )(x, fp["w"], fp["b"])


def avg_pool_2x2(x):
    N, H, W, C = x.shape
    Ho, Wo = H // 2, W // 2
    return pl.pallas_call(
        _avg_pool_kernel,
        out_shape=jax.ShapeDtypeStruct((N, Ho, Wo, C), jnp.float32),
        grid=(N,),
        in_specs=[pl.BlockSpec((1, H, W, C), lambda n: (n, 0, 0, 0))],
        out_specs=pl.BlockSpec((1, Ho, Wo, C), lambda n: (n, 0, 0, 0)),
        scratch_shapes=[pltpu.VMEM((Ho, W, C), jnp.float32)],
        compiler_params=pltpu.CompilerParams(dimension_semantics=("parallel",)),
    )(x)


def blend(a, b, alpha):
    """(1 - alpha) * a + alpha * b, alpha delivered as an SMEM scalar."""
    N, H, W, C = a.shape
    alpha_arr = jnp.asarray([alpha], jnp.float32)
    return pl.pallas_call(
        _blend_kernel,
        out_shape=jax.ShapeDtypeStruct(a.shape, jnp.float32),
        grid=(N,),
        in_specs=[
            pl.BlockSpec(memory_space=pltpu.MemorySpace.SMEM),
            pl.BlockSpec((1, H, W, C), lambda n: (n, 0, 0, 0)),
            pl.BlockSpec((1, H, W, C), lambda n: (n, 0, 0, 0)),
        ],
        out_specs=pl.BlockSpec((1, H, W, C), lambda n: (n, 0, 0, 0)),
        compiler_params=pltpu.CompilerParams(dimension_semantics=("parallel",)),
    )(alpha_arr, a, b)


# ------------------------------- parameters ---------------------------------

def _ws_params(key, in_ch, out_ch, k, gain=2.0):
    # Matches WSConv2d.__init__: weight ~ N(0,1), bias = 0,
    # scale = sqrt(gain / (in_channels * kernel_size**2)).
    w = jax.random.normal(key, (out_ch, in_ch, k, k), jnp.float32)
    return dict(w=w, b=jnp.zeros((out_ch,), jnp.float32),
                scale=float((gain / (in_ch * k * k)) ** 0.5), k=k)


def init_discriminator_params(key):
    ki = iter(jax.random.split(key, 32))
    from_rgb_p = [_ws_params(next(ki), 3, oc, 1)
                  for oc in (16, 32, 64, 128, 256, 256)]
    blocks = []
    for ic, oc in ((16, 32), (32, 64), (64, 128), (128, 256), (256, 256)):
        blocks.append(dict(kind="block",
                           conv1=_ws_params(next(ki), ic, ic, 3),
                           conv2=_ws_params(next(ki), ic, oc, 3)))
    blocks.append(dict(kind="last",
                       conv1=_ws_params(next(ki), 257, 256, 3),
                       conv2=_ws_params(next(ki), 256, 256, 4),
                       conv3=_ws_params(next(ki), 256, 1, 1, gain=1.0)))
    return dict(from_rgb=from_rgb_p, blocks=blocks)


def _prep_conv(p):
    """Fold WS scale into the weights once; (out,in,kh,kw) -> (k*k, in, out) bf16."""
    out_ch, in_ch, k, _ = p["w"].shape
    w = (jnp.transpose(p["w"], (2, 3, 1, 0)).reshape(k * k, in_ch, out_ch)
         * p["scale"]).astype(jnp.bfloat16)
    return dict(w=w, b=p["b"].reshape(1, out_ch).astype(jnp.float32),
                cin=in_ch, cout=out_ch, k=k)


def prepare_kernel_params(params):
    """One-time transformation of PyTorch-layout params to kernel layout."""
    kp = dict(from_rgb=[], blocks=[])
    for p in params["from_rgb"]:
        out_ch, in_ch = p["w"].shape[0], p["w"].shape[1]
        w = (jnp.transpose(p["w"], (2, 3, 1, 0)).reshape(in_ch, out_ch)
             * p["scale"]).astype(jnp.bfloat16)
        kp["from_rgb"].append(dict(w=w, b=p["b"].reshape(1, out_ch), cout=out_ch))
    for b in params["blocks"]:
        if b["kind"] == "block":
            kp["blocks"].append(dict(kind="block",
                                     conv1=_prep_conv(b["conv1"]),
                                     conv2=_prep_conv(b["conv2"])))
        else:
            w3 = (b["conv3"]["w"].reshape(1, -1) * b["conv3"]["scale"]).astype(jnp.float32)
            b3 = b["conv3"]["b"].reshape(1, 1).astype(jnp.float32)
            kp["blocks"].append(dict(kind="last",
                                     conv1=_prep_conv(b["conv1"]),
                                     conv2=_prep_conv(b["conv2"]),
                                     w3=w3, b3=b3))
    return kp


# ------------------------------- forward pass --------------------------------

def apply_block(x, bp):
    if bp["kind"] == "block":
        return disc_block(x, bp)
    return last_block(x, bp)


def discriminator_forward(kparams, img_nchw, current_level, alpha):
    x = jnp.transpose(img_nchw, (0, 2, 3, 1)).astype(jnp.float32)  # NCHW -> NHWC
    n_layers = len(kparams["blocks"])
    first_layer = n_layers - current_level - 1
    if alpha < 1.0:
        ds_img = avg_pool_2x2(x)
        v_from_ds = from_rgb(ds_img, kparams["from_rgb"][first_layer + 1])
        vector = from_rgb(x, kparams["from_rgb"][first_layer])
        ds_vector = apply_block(vector, kparams["blocks"][first_layer])
        y = blend(v_from_ds, ds_vector, alpha)
    else:
        y = from_rgb(x, kparams["from_rgb"][first_layer])
        y = apply_block(y, kparams["blocks"][first_layer])
    for level in range(first_layer + 1, n_layers):
        y = apply_block(y, kparams["blocks"][level])
    return y.reshape(y.shape[0], -1)


# --------------------------- pure-JAX reference ------------------------------

def _ref_ws_conv(x, p, padding, slope=None):
    w = jnp.transpose(p["w"], (2, 3, 1, 0))               # HWIO
    y = jax.lax.conv_general_dilated(
        x * p["scale"], w, (1, 1),
        [(padding, padding), (padding, padding)],
        dimension_numbers=("NHWC", "HWIO", "NHWC"),
        precision=jax.lax.Precision.HIGHEST)
    y = y + p["b"][None, None, None, :]
    if slope is not None:
        y = jnp.where(y >= 0, y, slope * y)
    return y


def _ref_blur(x):
    C = x.shape[-1]
    k2 = (_BLUR_1D[:, None] * _BLUR_1D[None, :]) / 16.0
    w = jnp.tile(k2[:, :, None, None], (1, 1, 1, C))      # (3,3,1,C)
    return jax.lax.conv_general_dilated(
        x, w, (1, 1), [(1, 1), (1, 1)],
        dimension_numbers=("NHWC", "HWIO", "NHWC"),
        feature_group_count=C, precision=jax.lax.Precision.HIGHEST)


def _ref_pool(x):
    s = jax.lax.reduce_window(x, 0.0, jax.lax.add,
                              (1, 2, 2, 1), (1, 2, 2, 1), "VALID")
    return s * 0.25


def _ref_mbstd(x):
    mean = jnp.mean(x, axis=0, keepdims=True)
    var = jnp.sum((x - mean) ** 2, axis=0) / (x.shape[0] - 1)
    s = jnp.mean(jnp.sqrt(var))
    stat = jnp.broadcast_to(s, (x.shape[0], x.shape[1], x.shape[2], 1))
    return jnp.concatenate([x, stat], axis=-1)


def _ref_block(x, p):
    if p["kind"] == "block":
        x = _ref_ws_conv(x, p["conv1"], 1, LEAKY_SLOPE)
        x = _ref_blur(x)
        x = _ref_ws_conv(x, p["conv2"], 1, LEAKY_SLOPE)
        x = _ref_pool(x)
    else:
        x = _ref_mbstd(x)
        x = _ref_ws_conv(x, p["conv1"], 1, LEAKY_SLOPE)
        x = _ref_ws_conv(x, p["conv2"], 0, LEAKY_SLOPE)
        x = _ref_ws_conv(x, p["conv3"], 0)
    return x


def _ref_forward(params, img_nchw, current_level, alpha):
    x = jnp.transpose(img_nchw, (0, 2, 3, 1)).astype(jnp.float32)
    n_layers = len(params["blocks"])
    first_layer = n_layers - current_level - 1
    if alpha < 1.0:
        v_ds = _ref_ws_conv(_ref_pool(x), params["from_rgb"][first_layer + 1], 0)
        vec = _ref_ws_conv(x, params["from_rgb"][first_layer], 0)
        dv = _ref_block(vec, params["blocks"][first_layer])
        y = (1.0 - alpha) * v_ds + alpha * dv
    else:
        y = _ref_ws_conv(x, params["from_rgb"][first_layer], 0)
        y = _ref_block(y, params["blocks"][first_layer])
    for level in range(first_layer + 1, n_layers):
        y = _ref_block(y, params["blocks"][level])
    return y.reshape(y.shape[0], -1)


# ----------------------------------- main ------------------------------------

if __name__ == "__main__":
    key = jax.random.PRNGKey(0)
    pkey, ikey = jax.random.split(key)
    params = init_discriminator_params(pkey)
    kparams = prepare_kernel_params(params)   # scale folded / bf16 cast, once

    # current_level=2 -> 16x16 input resolution; alpha<1 exercises the
    # progressive-growing blend path (from_rgb on downsampled image + block).
    img = jax.random.normal(ikey, (2, 3, 16, 16), jnp.float32)   # NCHW, as PyTorch
    current_level, alpha = 2, 0.7

    out = discriminator_forward(kparams, img, current_level, alpha)
    out = jax.block_until_ready(out)
    assert out.shape == (2, 1), out.shape
    assert bool(jnp.all(jnp.isfinite(out)))

    # Sanity check against a pure-JAX (XLA, f32) reference of the same forward.
    ref = jax.block_until_ready(_ref_forward(params, img, current_level, alpha))
    assert bool(jnp.allclose(out, ref, rtol=5e-2, atol=5e-2)), (out, ref)

    print("KERNEL_OK")
</pallas_src>

<mosaic_0001>
module attributes {stable_mosaic.version = 11 : i64} {
  func.func @_avg_pool_kernel(%arg0: i32, %arg1: memref<1x16x16x3xf32, #tpu.memory_space<vmem>>, %arg2: memref<1x8x8x3xf32, #tpu.memory_space<vmem>>, %arg3: memref<8x16x3xf32, #tpu.memory_space<vmem>>) attributes {dimension_semantics = [#tpu.dimension_semantics<parallel>], iteration_bounds = array<i64: 2>, scalar_prefetch = 0 : i64, scratch_operands = 1 : i64, tpu.core_type = #tpu.core_type<tc>, window_params = [{transform_indices = @transform_0, window_bounds = array<i64: 1, 16, 16, 3>}, {transform_indices = @transform_1, window_bounds = array<i64: 1, 8, 8, 3>}]} {
    %c0 = arith.constant 0 : index
    %c0_0 = arith.constant 0 : index
    %c0_1 = arith.constant 0 : index
    %c0_2 = arith.constant 0 : index
    %0 = vector.load %arg1[%c0, %c0_0, %c0_1, %c0_2] : memref<1x16x16x3xf32, #tpu.memory_space<vmem>>, vector<1x16x16x3xf32>
    %1 = vector.shape_cast %0 : vector<1x16x16x3xf32> to vector<16x16x3xf32>
    %2 = vector.shape_cast %1 : vector<16x16x3xf32> to vector<8x2x16x3xf32>
    %3 = vector.extract_strided_slice %2 {offsets = [0, 0, 0, 0], sizes = [8, 1, 16, 3], strides = [1, 1, 1, 1]} : vector<8x2x16x3xf32> to vector<8x1x16x3xf32>
    %4 = vector.shape_cast %3 : vector<8x1x16x3xf32> to vector<8x16x3xf32>
    %5 = vector.extract_strided_slice %2 {offsets = [0, 1, 0, 0], sizes = [8, 1, 16, 3], strides = [1, 1, 1, 1]} : vector<8x2x16x3xf32> to vector<8x1x16x3xf32>
    %6 = vector.shape_cast %5 : vector<8x1x16x3xf32> to vector<8x16x3xf32>
    %7 = arith.addf %4, %6 : vector<8x16x3xf32>
    %c0_3 = arith.constant 0 : index
    %c0_4 = arith.constant 0 : index
    %c0_5 = arith.constant 0 : index
    %8 = vector.load %arg3[%c0_3, %c0_4, %c0_5] : memref<8x16x3xf32, #tpu.memory_space<vmem>>, vector<8x16x3xf32>
    tpu.vector_store %arg3[%c0_3, %c0_4, %c0_5], %7 {strides = array<i32>} : memref<8x16x3xf32, #tpu.memory_space<vmem>>, vector<8x16x3xf32>,
    %c0_6 = arith.constant 0 : index
    %c0_7 = arith.constant 0 : index
    %c0_8 = arith.constant 0 : index
    %9 = vector.load %arg3[%c0_6, %c0_7, %c0_8] : memref<8x16x3xf32, #tpu.memory_space<vmem>>, vector<8x1x3xf32>
    %10 = vector.shape_cast %9 : vector<8x1x3xf32> to vector<8x3xf32>
    %c0_9 = arith.constant 0 : index
    %c1 = arith.constant 1 : index
    %c0_10 = arith.constant 0 : index
    %11 = vector.load %arg3[%c0_9, %c1, %c0_10] : memref<8x16x3xf32, #tpu.memory_space<vmem>>, vector<8x1x3xf32>
    %12 = vector.shape_cast %11 : vector<8x1x3xf32> to vector<8x3xf32>
    %13 = arith.addf %10, %12 : vector<8x3xf32>
    %cst = arith.constant 2.500000e-01 : f32
    %14 = vector.broadcast %cst : f32 to vector<8x3xf32>
    %15 = arith.mulf %14, %13 : vector<8x3xf32>
    %c0_11 = arith.constant 0 : index
    %c0_12 = arith.constant 0 : index
    %c0_13 = arith.constant 0 : index
    %c0_14 = arith.constant 0 : index
    %16 = vector.load %arg2[%c0_11, %c0_12, %c0_13, %c0_14] : memref<1x8x8x3xf32, #tpu.memory_space<vmem>>, vector<1x8x1x3xf32>
    %17 = vector.shape_cast %16 : vector<1x8x1x3xf32> to vector<8x3xf32>
    %18 = vector.shape_cast %15 : vector<8x3xf32> to vector<1x8x1x3xf32>
    tpu.vector_store %arg2[%c0_11, %c0_12, %c0_13, %c0_14], %18 {strides = array<i32>} : memref<1x8x8x3xf32, #tpu.memory_space<vmem>>, vector<1x8x1x3xf32>,
    %c0_15 = arith.constant 0 : index
    %c2 = arith.constant 2 : index
    %c0_16 = arith.constant 0 : index
    %19 = vector.load %arg3[%c0_15, %c2, %c0_16] : memref<8x16x3xf32, #tpu.memory_space<vmem>>, vector<8x1x3xf32>
    %20 = vector.shape_cast %19 : vector<8x1x3xf32> to vector<8x3xf32>
    %c0_17 = arith.constant 0 : index
    %c3 = arith.constant 3 : index
    %c0_18 = arith.constant 0 : index
    %21 = vector.load %arg3[%c0_17, %c3, %c0_18] : memref<8x16x3xf32, #tpu.memory_space<vmem>>, vector<8x1x3xf32>
    %22 = vector.shape_cast %21 : vector<8x1x3xf32> to vector<8x3xf32>
    %23 = arith.addf %20, %22 : vector<8x3xf32>
    %cst_19 = arith.constant 2.500000e-01 : f32
    %24 = vector.broadcast %cst_19 : f32 to vector<8x3xf32>
    %25 = arith.mulf %24, %23 : vector<8x3xf32>
    %c0_20 = arith.constant 0 : index
    %c0_21 = arith.constant 0 : index
    %c1_22 = arith.constant 1 : index
    %c0_23 = arith.constant 0 : index
    %26 = vector.load %arg2[%c0_20, %c0_21, %c1_22, %c0_23] : memref<1x8x8x3xf32, #tpu.memory_space<vmem>>, vector<1x8x1x3xf32>
    %27 = vector.shape_cast %26 : vector<1x8x1x3xf32> to vector<8x3xf32>
    %28 = vector.shape_cast %25 : vector<8x3xf32> to vector<1x8x1x3xf32>
    tpu.vector_store %arg2[%c0_20, %c0_21, %c1_22, %c0_23], %28 {strides = array<i32>} : memref<1x8x8x3xf32, #tpu.memory_space<vmem>>, vector<1x8x1x3xf32>,
    %c0_24 = arith.constant 0 : index
    %c4 = arith.constant 4 : index
    %c0_25 = arith.constant 0 : index
    %29 = vector.load %arg3[%c0_24, %c4, %c0_25] : memref<8x16x3xf32, #tpu.memory_space<vmem>>, vector<8x1x3xf32>
    %30 = vector.shape_cast %29 : vector<8x1x3xf32> to vector<8x3xf32>
    %c0_26 = arith.constant 0 : index
    %c5 = arith.constant 5 : index
    %c0_27 = arith.constant 0 : index
    %31 = vector.load %arg3[%c0_26, %c5, %c0_27] : memref<8x16x3xf32, #tpu.memory_space<vmem>>, vector<8x1x3xf32>
    %32 = vector.shape_cast %31 : vector<8x1x3xf32> to vector<8x3xf32>
    %33 = arith.addf %30, %32 : vector<8x3xf32>
    %cst_28 = arith.constant 2.500000e-01 : f32
    %34 = vector.broadcast %cst_28 : f32 to vector<8x3xf32>
    %35 = arith.mulf %34, %33 : vector<8x3xf32>
    %c0_29 = arith.constant 0 : index
    %c0_30 = arith.constant 0 : index
    %c2_31 = arith.constant 2 : index
    %c0_32 = arith.constant 0 : index
    %36 = vector.load %arg2[%c0_29, %c0_30, %c2_31, %c0_32] : memref<1x8x8x3xf32, #tpu.memory_space<vmem>>, vector<1x8x1x3xf32>
    %37 = vector.shape_cast %36 : vector<1x8x1x3xf32> to vector<8x3xf32>
    %38 = vector.shape_cast %35 : vector<8x3xf32> to vector<1x8x1x3xf32>
    tpu.vector_store %arg2[%c0_29, %c0_30, %c2_31, %c0_32], %38 {strides = array<i32>} : memref<1x8x8x3xf32, #tpu.memory_space<vmem>>, vector<1x8x1x3xf32>,
    %c0_33 = arith.constant 0 : index
    %c6 = arith.constant 6 : index
    %c0_34 = arith.constant 0 : index
    %39 = vector.load %arg3[%c0_33, %c6, %c0_34] : memref<8x16x3xf32, #tpu.memory_space<vmem>>, vector<8x1x3xf32>
    %40 = vector.shape_cast %39 : vector<8x1x3xf32> to vector<8x3xf32>
    %c0_35 = arith.constant 0 : index
    %c7 = arith.constant 7 : index
    %c0_36 = arith.constant 0 : index
    %41 = vector.load %arg3[%c0_35, %c7, %c0_36] : memref<8x16x3xf32, #tpu.memory_space<vmem>>, vector<8x1x3xf32>
    %42 = vector.shape_cast %41 : vector<8x1x3xf32> to vector<8x3xf32>
    %43 = arith.addf %40, %42 : vector<8x3xf32>
    %cst_37 = arith.constant 2.500000e-01 : f32
    %44 = vector.broadcast %cst_37 : f32 to vector<8x3xf32>
    %45 = arith.mulf %44, %43 : vector<8x3xf32>
    %c0_38 = arith.constant 0 : index
    %c0_39 = arith.constant 0 : index
    %c3_40 = arith.constant 3 : index
    %c0_41 = arith.constant 0 : index
    %46 = vector.load %arg2[%c0_38, %c0_39, %c3_40, %c0_41] : memref<1x8x8x3xf32, #tpu.memory_space<vmem>>, vector<1x8x1x3xf32>
    %47 = vector.shape_cast %46 : vector<1x8x1x3xf32> to vector<8x3xf32>
    %48 = vector.shape_cast %45 : vector<8x3xf32> to vector<1x8x1x3xf32>
    tpu.vector_store %arg2[%c0_38, %c0_39, %c3_40, %c0_41], %48 {strides = array<i32>} : memref<1x8x8x3xf32, #tpu.memory_space<vmem>>, vector<1x8x1x3xf32>,
    %c0_42 = arith.constant 0 : index
    %c8 = arith.constant 8 : index
    %c0_43 = arith.constant 0 : index
    %49 = vector.load %arg3[%c0_42, %c8, %c0_43] : memref<8x16x3xf32, #tpu.memory_space<vmem>>, vector<8x1x3xf32>
    %50 = vector.shape_cast %49 : vector<8x1x3xf32> to vector<8x3xf32>
    %c0_44 = arith.constant 0 : index
    %c9 = arith.constant 9 : index
    %c0_45 = arith.constant 0 : index
    %51 = vector.load %arg3[%c0_44, %c9, %c0_45] : memref<8x16x3xf32, #tpu.memory_space<vmem>>, vector<8x1x3xf32>
    %52 = vector.shape_cast %51 : vector<8x1x3xf32> to vector<8x3xf32>
    %53 = arith.addf %50, %52 : vector<8x3xf32>
    %cst_46 = arith.constant 2.500000e-01 : f32
    %54 = vector.broadcast %cst_46 : f32 to vector<8x3xf32>
    %55 = arith.mulf %54, %53 : vector<8x3xf32>
    %c0_47 = arith.constant 0 : index
    %c0_48 = arith.constant 0 : index
    %c4_49 = arith.constant 4 : index
    %c0_50 = arith.constant 0 : index
    %56 = vector.load %arg2[%c0_47, %c0_48, %c4_49, %c0_50] : memref<1x8x8x3xf32, #tpu.memory_space<vmem>>, vector<1x8x1x3xf32>
    %57 = vector.shape_cast %56 : vector<1x8x1x3xf32> to vector<8x3xf32>
    %58 = vector.shape_cast %55 : vector<8x3xf32> to vector<1x8x1x3xf32>
    tpu.vector_store %arg2[%c0_47, %c0_48, %c4_49, %c0_50], %58 {strides = array<i32>} : memref<1x8x8x3xf32, #tpu.memory_space<vmem>>, vector<1x8x1x3xf32>,
    %c0_51 = arith.constant 0 : index
    %c10 = arith.constant 10 : index
    %c0_52 = arith.constant 0 : index
    %59 = vector.load %arg3[%c0_51, %c10, %c0_52] : memref<8x16x3xf32, #tpu.memory_space<vmem>>, vector<8x1x3xf32>
    %60 = vector.shape_cast %59 : vector<8x1x3xf32> to vector<8x3xf32>
    %c0_53 = arith.constant 0 : index
    %c11 = arith.constant 11 : index
    %c0_54 = arith.constant 0 : index
    %61 = vector.load %arg3[%c0_53, %c11, %c0_54] : memref<8x16x3xf32, #tpu.memory_space<vmem>>, vector<8x1x3xf32>
    %62 = vector.shape_cast %61 : vector<8x1x3xf32> to vector<8x3xf32>
    %63 = arith.addf %60, %62 : vector<8x3xf32>
    %cst_55 = arith.constant 2.500000e-01 : f32
    %64 = vector.broadcast %cst_55 : f32 to vector<8x3xf32>
    %65 = arith.mulf %64, %63 : vector<8x3xf32>
    %c0_56 = arith.constant 0 : index
    %c0_57 = arith.constant 0 : index
    %c5_58 = arith.constant 5 : index
    %c0_59 = arith.constant 0 : index
    %66 = vector.load %arg2[%c0_56, %c0_57, %c5_58, %c0_59] : memref<1x8x8x3xf32, #tpu.memory_space<vmem>>, vector<1x8x1x3xf32>
    %67 = vector.shape_cast %66 : vector<1x8x1x3xf32> to vector<8x3xf32>
    %68 = vector.shape_cast %65 : vector<8x3xf32> to vector<1x8x1x3xf32>
    tpu.vector_store %arg2[%c0_56, %c0_57, %c5_58, %c0_59], %68 {strides = array<i32>} : memref<1x8x8x3xf32, #tpu.memory_space<vmem>>, vector<1x8x1x3xf32>,
    %c0_60 = arith.constant 0 : index
    %c12 = arith.constant 12 : index
    %c0_61 = arith.constant 0 : index
    %69 = vector.load %arg3[%c0_60, %c12, %c0_61] : memref<8x16x3xf32, #tpu.memory_space<vmem>>, vector<8x1x3xf32>
    %70 = vector.shape_cast %69 : vector<8x1x3xf32> to vector<8x3xf32>
    %c0_62 = arith.constant 0 : index
    %c13 = arith.constant 13 : index
    %c0_63 = arith.constant 0 : index
    %71 = vector.load %arg3[%c0_62, %c13, %c0_63] : memref<8x16x3xf32, #tpu.memory_space<vmem>>, vector<8x1x3xf32>
    %72 = vector.shape_cast %71 : vector<8x1x3xf32> to vector<8x3xf32>
    %73 = arith.addf %70, %72 : vector<8x3xf32>
    %cst_64 = arith.constant 2.500000e-01 : f32
    %74 = vector.broadcast %cst_64 : f32 to vector<8x3xf32>
    %75 = arith.mulf %74, %73 : vector<8x3xf32>
    %c0_65 = arith.constant 0 : index
    %c0_66 = arith.constant 0 : index
    %c6_67 = arith.constant 6 : index
    %c0_68 = arith.constant 0 : index
    %76 = vector.load %arg2[%c0_65, %c0_66, %c6_67, %c0_68] : memref<1x8x8x3xf32, #tpu.memory_space<vmem>>, vector<1x8x1x3xf32>
    %77 = vector.shape_cast %76 : vector<1x8x1x3xf32> to vector<8x3xf32>
    %78 = vector.shape_cast %75 : vector<8x3xf32> to vector<1x8x1x3xf32>
    tpu.vector_store %arg2[%c0_65, %c0_66, %c6_67, %c0_68], %78 {strides = array<i32>} : memref<1x8x8x3xf32, #tpu.memory_space<vmem>>, vector<1x8x1x3xf32>,
    %c0_69 = arith.constant 0 : index
    %c14 = arith.constant 14 : index
    %c0_70 = arith.constant 0 : index
    %79 = vector.load %arg3[%c0_69, %c14, %c0_70] : memref<8x16x3xf32, #tpu.memory_space<vmem>>, vector<8x1x3xf32>
    %80 = vector.shape_cast %79 : vector<8x1x3xf32> to vector<8x3xf32>
    %c0_71 = arith.constant 0 : index
    %c15 = arith.constant 15 : index
    %c0_72 = arith.constant 0 : index
    %81 = vector.load %arg3[%c0_71, %c15, %c0_72] : memref<8x16x3xf32, #tpu.memory_space<vmem>>, vector<8x1x3xf32>
    %82 = vector.shape_cast %81 : vector<8x1x3xf32> to vector<8x3xf32>
    %83 = arith.addf %80, %82 : vector<8x3xf32>
    %cst_73 = arith.constant 2.500000e-01 : f32
    %84 = vector.broadcast %cst_73 : f32 to vector<8x3xf32>
    %85 = arith.mulf %84, %83 : vector<8x3xf32>
    %c0_74 = arith.constant 0 : index
    %c0_75 = arith.constant 0 : index
    %c7_76 = arith.constant 7 : index
    %c0_77 = arith.constant 0 : index
    %86 = vector.load %arg2[%c0_74, %c0_75, %c7_76, %c0_77] : memref<1x8x8x3xf32, #tpu.memory_space<vmem>>, vector<1x8x1x3xf32>
    %87 = vector.shape_cast %86 : vector<1x8x1x3xf32> to vector<8x3xf32>
    %88 = vector.shape_cast %85 : vector<8x3xf32> to vector<1x8x1x3xf32>
    tpu.vector_store %arg2[%c0_74, %c0_75, %c7_76, %c0_77], %88 {strides = array<i32>} : memref<1x8x8x3xf32, #tpu.memory_space<vmem>>, vector<1x8x1x3xf32>,
    return
  }
  func.func @transform_0(%arg0: i32) -> (i32, i32, i32, i32) {
    %c0_i32 = arith.constant 0 : i32
    %c0_i32_0 = arith.constant 0 : i32
    %c0_i32_1 = arith.constant 0 : i32
    %c0_i32_2 = arith.constant 0 : i32
    return %arg0, %c0_i32, %c0_i32_0, %c0_i32_1 : i32, i32, i32, i32
  }
  func.func @transform_1(%arg0: i32) -> (i32, i32, i32, i32) {
    %c0_i32 = arith.constant 0 : i32
    %c0_i32_0 = arith.constant 0 : i32
    %c0_i32_1 = arith.constant 0 : i32
    %c0_i32_2 = arith.constant 0 : i32
    return %arg0, %c0_i32, %c0_i32_0, %c0_i32_1 : i32, i32, i32, i32
  }
}

</mosaic_0001>

<bundles_post_ra>
// kernel: tpu_custom_call.1
= control target key start
LH: loop header
LB: loop body
LE: loop exit
PB: predicated region body
PF: predicated region fallthrough
CT: control target
= control target key end

     0   :  { %s597_s6 = smov 0   ;;  %s798_s0 = inlined_call_operand.vmem [shape: f32[2,16,16,3], index: 0, kind: input, shape index: {}]   ;;  %s799_s1 = inlined_call_operand.vmem [shape: f32[2,8,8,3], index: 1, kind: output, shape index: {}]  }
   0x1 LB: > { %s558_s7 = sadd.s32 4294967295, %s585_s6   ;;  %p562_p0 = scmp.ge.s32.totalorder %s585_s6, 1  ;;  %s585_s6 = sphi %s597_s6, %s11_s6  }
   0x2   : > { %p87_p1 = scmp.lt.s32.totalorder %s585_s6, 3 }
   0x4   : > { %p88_p2 = pnand %p562_p0, %p87_p1 }
   0x5   : > { %p107_p3 = scmp.lt.s32.totalorder (!%p88_p2), %s558_s7, 1 }
   0x6   : > { %91 = sbr.rel (%p88_p2) target bundleno = 113 (0x71), region = 24 }
   0xb   : > { %s801_s7 = smov (!%p107_p3, %s558_s7), 1  ;;  %vm165_vm0 = vcmask 23552   ;;  %vm214_vm1 = vcmask 16384  }
   0xc   : > { %s569_s8 = sshll.u32 %s801_s7, 8  ;;  %s570_s12 = sshll.u32 %s801_s7, 6 }
   0xd   : > { %s611_s11 = scalar_lea.vmem %s798_s0, %s569_s8  ;;  %s662_s15 = scalar_lea.vmem %s799_s1, %s570_s12 }
   0xe   : > { %v117_v0 = vld [vmem:[%s611_s11] sm:$0xff]  ;;  %v119_v1 = vld [vmem:[%s611_s11 + $0x10] sm:$0xff]  ;;  %v118_v2 = vld [vmem:[%s611_s11 + $0x8] sm:$0xff] }
   0xf   : > { %v149_v3 = vadd.f32 %v119_v1, %v117_v0  ;;  %v120_v4 = vld [vmem:[%s611_s11 + $0x18] sm:$0xff]  ;;  %v121_v5 = vld [vmem:[%s611_s11 + $0x20] sm:$0xff]  ;;  %v123_v6 = vld [vmem:[%s611_s11 + $0x30] sm:$0xff] }
  0x10   : > { %v150_v7 = vadd.f32 %v120_v4, %v118_v2  ;;  %v151_v8 = vadd.f32 %v123_v6, %v121_v5  ;;  %v122_v9 = vld [vmem:[%s611_s11 + $0x28] sm:$0xff]  ;;  %v124_v10 = vld [vmem:[%s611_s11 + $0x38] sm:$0xff]  ;;  %v125_v11 = vld [vmem:[%s611_s11 + $0x40] sm:$0xff] }
  0x11   : > { %166 = vst.msk [vmem:[#allocation2] sm:$0xff] %vm165_vm0, %v149_v3  ;;  %v152_v12 = vadd.f32 %v124_v10, %v122_v9  ;;  %v127_v13 = vld [vmem:[%s611_s11 + $0x50] sm:$0xff]  ;;  %v126_v14 = vld [vmem:[%s611_s11 + $0x48] sm:$0xff]  ;;  %v128_v15 = vld [vmem:[%s611_s11 + $0x58] sm:$0xff] }
  0x12   : > { %167 = vst.msk [vmem:[#allocation2 + $0x8] sm:$0xff] %vm165_vm0, %v150_v7  ;;  %v153_v16 = vadd.f32 %v127_v13, %v125_v11  ;;  %v154_v17 = vadd.f32 %v128_v15, %v126_v14  ;;  %v129_v18 = vld [vmem:[%s611_s11 + $0x60] sm:$0xff]  ;;  %v131_v19 = vld [vmem:[%s611_s11 + $0x70] sm:$0xff]  ;;  %v130_v20 = vld [vmem:[%s611_s11 + $0x68] sm:$0xff] }
  0x13   : > { %168 = vst.msk [vmem:[#allocation2 + $0x10] sm:$0xff] %vm165_vm0, %v151_v8  ;;  %v155_v21 = vadd.f32 %v131_v19, %v129_v18  ;;  %v132_v22 = vld [vmem:[%s611_s11 + $0x78] sm:$0xff]  ;;  %v133_v23 = vld [vmem:[%s611_s11 + $0x80] sm:$0xff]  ;;  %v135_v24 = vld [vmem:[%s611_s11 + $0x90] sm:$0xff] }
  0x14   : > { %169 = vst.msk [vmem:[#allocation2 + $0x18] sm:$0xff] %vm165_vm0, %v152_v12  ;;  %v156_v25 = vadd.f32 %v132_v22, %v130_v20  ;;  %v134_v26 = vld [vmem:[%s611_s11 + $0x88] sm:$0xff]  ;;  %v136_v27 = vld [vmem:[%s611_s11 + $0x98] sm:$0xff]  ;;  %v137_v28 = vld [vmem:[%s611_s11 + $0xa0] sm:$0xff]  ;;  %v157_v29 = vadd.f32 %v135_v24, %v133_v23 }
  0x15   : > { %170 = vst.msk [vmem:[#allocation2 + $0x20] sm:$0xff] %vm165_vm0, %v153_v16  ;;  %v139_v30 = vld [vmem:[%s611_s11 + $0xb0] sm:$0xff]  ;;  %v138_v31 = vld [vmem:[%s611_s11 + $0xa8] sm:$0xff]  ;;  %v140_v32 = vld [vmem:[%s611_s11 + $0xb8] sm:$0xff]  ;;  %v158_v33 = vadd.f32 %v136_v27, %v134_v26 }
  0x16   : > { %171 = vst.msk [vmem:[#allocation2 + $0x28] sm:$0xff] %vm165_vm0, %v154_v17  ;;  %v141_v34 = vld [vmem:[%s611_s11 + $0xc0] sm:$0xff]  ;;  %v143_v35 = vld [vmem:[%s611_s11 + $0xd0] sm:$0xff]  ;;  %v159_v36 = vadd.f32 %v139_v30, %v137_v28  ;;  %v142_v37 = vld [vmem:[%s611_s11 + $0xc8] sm:$0xff]  ;;  %v160_v40 = vadd.f32 %v140_v32, %v138_v31 }
  0x17   : > { %172 = vst.msk [vmem:[#allocation2 + $0x30] sm:$0xff] %vm165_vm0, %v155_v21  ;;  %v144_v38 = vld [vmem:[%s611_s11 + $0xd8] sm:$0xff]  ;;  %v145_v39 = vld [vmem:[%s611_s11 + $0xe0] sm:$0xff]  ;;  %v147_v41 = vld [vmem:[%s611_s11 + $0xf0] sm:$0xff]  ;;  %v161_v44 = vadd.f32 %v143_v35, %v141_v34 }
  0x18   : > { %173 = vst.msk [vmem:[#allocation2 + $0x38] sm:$0xff] %vm165_vm0, %v156_v25  ;;  %v146_v42 = vld [vmem:[%s611_s11 + $0xe8] sm:$0xff]  ;;  %v182_v43 = vld [vmem:[#allocation2] sm:$0x1]  ;;  %v148_v45 = vld [vmem:[%s611_s11 + $0xf8] sm:$0xff]  ;;  %v162_v48 = vadd.f32 %v144_v38, %v142_v37  ;;  %v163_v52 = vadd.f32 %v147_v41, %v145_v39 }
  0x19   : > { %174 = vst.msk [vmem:[#allocation2 + $0x40] sm:$0xff] %vm165_vm0, %v157_v29  ;;  %v190_v46 = vld [vmem:[#allocation2 + $0x1] sm:$0x1]  ;;  %v223_v47 = vld [vmem:[#allocation2 + $0x2] sm:$0x1]  ;;  %v164_v56 = vadd.f32 %v148_v45, %v146_v42 }
  0x1a   : > { %175 = vst.msk [vmem:[#allocation2 + $0x48] sm:$0xff] %vm165_vm0, %v158_v33  ;;  %v198_v49 = vadd.f32 %v190_v46, %v182_v43  ;;  %v183_v50 = vld [vmem:[#allocation2 + $0x10] sm:$0x1]  ;;  %v191_v51 = vld [vmem:[#allocation2 + $0x11] sm:$0x1] }
  0x1b   : > { %176 = vst.msk [vmem:[#allocation2 + $0x50] sm:$0xff] %vm165_vm0, %v159_v36  ;;  %v199_v53 = vadd.f32 %v191_v51, %v183_v50  ;;  %v231_v54 = vld [vmem:[#allocation2 + $0x3] sm:$0x1]  ;;  %v224_v55 = vld [vmem:[#allocation2 + $0x12] sm:$0x1] }
  0x1c   : > { %177 = vst.msk [vmem:[#allocation2 + $0x58] sm:$0xff] %vm165_vm0, %v160_v40  ;;  %v184_v57 = vld [vmem:[#allocation2 + $0x20] sm:$0x1]  ;;  %v192_v58 = vld [vmem:[#allocation2 + $0x21] sm:$0x1]  ;;  %v206_v59 = vmul.f32 0.25, %v198_v49  ;;  %v239_v61 = vadd.f32 %v231_v54, %v223_v47 }
  0x1d   : > { %178 = vst.msk [vmem:[#allocation2 + $0x60] sm:$0xff] %vm165_vm0, %v161_v44  ;;  %v200_v60 = vadd.f32 %v192_v58, %v184_v57  ;;  %v232_v62 = vld [vmem:[#allocation2 + $0x13] sm:$0x1]  ;;  %v225_v63 = vld [vmem:[#allocation2 + $0x22] sm:$0x1]  ;;  %v207_v0 = vmul.f32 0.25, %v199_v53 }
  0x1e   : > { %179 = vst.msk [vmem:[#allocation2 + $0x68] sm:$0xff] %vm165_vm0, %v162_v48  ;;  %v185_v1 = vld [vmem:[#allocation2 + $0x30] sm:$0x1]  ;;  %v193_v2 = vld [vmem:[#allocation2 + $0x31] sm:$0x1]  ;;  %v240_v5 = vadd.f32 %v232_v62, %v224_v55  ;;  %v247_v12 = vmul.f32 0.25, %v239_v61 }
  0x1f   : > { %180 = vst.msk [vmem:[#allocation2 + $0x70] sm:$0xff] %vm165_vm0, %v163_v52  ;;  %v208_v3 = vmul.f32 0.25, %v200_v60  ;;  %v201_v4 = vadd.f32 %v193_v2, %v185_v1  ;;  %v233_v6 = vld [vmem:[#allocation2 + $0x23] sm:$0x1]  ;;  %v226_v7 = vld [vmem:[#allocation2 + $0x32] sm:$0x1] }
  0x20   : > { %181 = vst.msk [vmem:[#allocation2 + $0x78] sm:$0xff] %vm165_vm0, %v164_v56  ;;  %v186_v8 = vld [vmem:[#allocation2 + $0x40] sm:$0x1]  ;;  %v194_v9 = vld [vmem:[#allocation2 + $0x41] sm:$0x1]  ;;  %v241_v13 = vadd.f32 %v233_v6, %v225_v63  ;;  %v248_v19 = vmul.f32 0.25, %v240_v5 }
  0x21   : > { %215 = vst.msk [vmem:[%s662_s15] sm:$0x1] %vm214_vm1, %v206_v59  ;;  %v209_v10 = vmul.f32 0.25, %v201_v4  ;;  %v202_v11 = vadd.f32 %v194_v9, %v186_v8  ;;  %v234_v14 = vld [vmem:[#allocation2 + $0x33] sm:$0x1] }
  0x22   : > { %216 = vst.msk [vmem:[%s662_s15 + $0x8] sm:$0x1] %vm214_vm1, %v207_v0  ;;  %v187_v15 = vld [vmem:[#allocation2 + $0x50] sm:$0x1]  ;;  %v195_v16 = vld [vmem:[#allocation2 + $0x51] sm:$0x1]  ;;  %v242_v23 = vadd.f32 %v234_v14, %v226_v7 }
  0x23   : > { %217 = vst.msk [vmem:[%s662_s15 + $0x10] sm:$0x1] %vm214_vm1, %v208_v3  ;;  %v210_v17 = vmul.f32 0.25, %v202_v11  ;;  %v203_v18 = vadd.f32 %v195_v16, %v187_v15  ;;  %v227_v20 = vld [vmem:[#allocation2 + $0x42] sm:$0x1]  ;;  %v249_v26 = vmul.f32 0.25, %v241_v13 }
  0x24   : > { %218 = vst.msk [vmem:[%s662_s15 + $0x18] sm:$0x1] %vm214_vm1, %v209_v10  ;;  %v188_v21 = vld [vmem:[#allocation2 + $0x60] sm:$0x1]  ;;  %v196_v22 = vld [vmem:[#allocation2 + $0x61] sm:$0x1] }
  0x25   : > { %219 = vst.msk [vmem:[%s662_s15 + $0x20] sm:$0x1] %vm214_vm1, %v210_v17  ;;  %v211_v24 = vmul.f32 0.25, %v203_v18  ;;  %v204_v25 = vadd.f32 %v196_v22, %v188_v21  ;;  %v235_v27 = vld [vmem:[#allocation2 + $0x43] sm:$0x1]  ;;  %v250_v34 = vmul.f32 0.25, %v242_v23 }
  0x26   : > { %v189_v28 = vld [vmem:[#allocation2 + $0x70] sm:$0x1]  ;;  %v197_v29 = vld [vmem:[#allocation2 + $0x71] sm:$0x1]  ;;  %255 = vst.msk [vmem:[%s662_s15 + $0x1] sm:$0x1] %vm214_vm1, %v247_v12  ;;  %v243_v30 = vadd.f32 %v235_v27, %v227_v20 }
  0x27   : > { %220 = vst.msk [vmem:[%s662_s15 + $0x28] sm:$0x1] %vm214_vm1, %v211_v24  ;;  %v212_v31 = vmul.f32 0.25, %v204_v25  ;;  %v205_v32 = vadd.f32 %v197_v29, %v189_v28  ;;  %v228_v33 = vld [vmem:[#allocation2 + $0x52] sm:$0x1] }
  0x28   : > { %256 = vst.msk [vmem:[%s662_s15 + $0x9] sm:$0x1] %vm214_vm1, %v248_v19  ;;  %v236_v35 = vld [vmem:[#allocation2 + $0x53] sm:$0x1]  ;;  %v251_v37 = vmul.f32 0.25, %v243_v30 }
  0x29   : > { %221 = vst.msk [vmem:[%s662_s15 + $0x30] sm:$0x1] %vm214_vm1, %v212_v31  ;;  %v213_v36 = vmul.f32 0.25, %v205_v32  ;;  %v244_v38 = vadd.f32 %v236_v35, %v228_v33  ;;  %v229_v39 = vld [vmem:[#allocation2 + $0x62] sm:$0x1] }
  0x2a   : > { %257 = vst.msk [vmem:[%s662_s15 + $0x11] sm:$0x1] %vm214_vm1, %v249_v26  ;;  %v237_v40 = vld [vmem:[#allocation2 + $0x63] sm:$0x1]  ;;  %v230_v41 = vld [vmem:[#allocation2 + $0x72] sm:$0x1] }
  0x2b   : > { %222 = vst.msk [vmem:[%s662_s15 + $0x38] sm:$0x1] %vm214_vm1, %v213_v36  ;;  %v252_v42 = vmul.f32 0.25, %v244_v38  ;;  %v245_v43 = vadd.f32 %v237_v40, %v229_v39  ;;  %v238_v44 = vld [vmem:[#allocation2 + $0x73] sm:$0x1] }
  0x2c   : > { %258 = vst.msk [vmem:[%s662_s15 + $0x19] sm:$0x1] %vm214_vm1, %v250_v34  ;;  %v246_v45 = vadd.f32 %v238_v44, %v230_v41  ;;  %v263_v46 = vld [vmem:[#allocation2 + $0x4] sm:$0x1]  ;;  %v271_v47 = vld [vmem:[#allocation2 + $0x5] sm:$0x1] }
  0x2d   : > { %259 = vst.msk [vmem:[%s662_s15 + $0x21] sm:$0x1] %vm214_vm1, %v251_v37  ;;  %v253_v48 = vmul.f32 0.25, %v245_v43  ;;  %v279_v49 = vadd.f32 %v271_v47, %v263_v46  ;;  %v264_v50 = vld [vmem:[#allocation2 + $0x14] sm:$0x1] }
  0x2e   : > { %260 = vst.msk [vmem:[%s662_s15 + $0x29] sm:$0x1] %vm214_vm1, %v252_v42  ;;  %v254_v51 = vmul.f32 0.25, %v246_v45  ;;  %v272_v52 = vld [vmem:[#allocation2 + $0x15] sm:$0x1] }
  0x2f   : > { %261 = vst.msk [vmem:[%s662_s15 + $0x31] sm:$0x1] %vm214_vm1, %v253_v48  ;;  %v287_v53 = vmul.f32 0.25, %v279_v49  ;;  %v280_v54 = vadd.f32 %v272_v52, %v264_v50  ;;  %v265_v55 = vld [vmem:[#allocation2 + $0x24] sm:$0x1] }
  0x30   : > { %262 = vst.msk [vmem:[%s662_s15 + $0x39] sm:$0x1] %vm214_vm1, %v254_v51  ;;  %v273_v56 = vld [vmem:[#allocation2 + $0x25] sm:$0x1]  ;;  %v266_v57 = vld [vmem:[#allocation2 + $0x34] sm:$0x1] }
  0x31   : > { %295 = vst.msk [vmem:[%s662_s15 + $0x2] sm:$0x1] %vm214_vm1, %v287_v53  ;;  %v288_v58 = vmul.f32 0.25, %v280_v54  ;;  %v281_v59 = vadd.f32 %v273_v56, %v265_v55  ;;  %v274_v60 = vld [vmem:[#allocation2 + $0x35] sm:$0x1] }
  0x32   : > { %v282_v61 = vadd.f32 %v274_v60, %v266_v57  ;;  %v267_v62 = vld [vmem:[#allocation2 + $0x44] sm:$0x1]  ;;  %v275_v63 = vld [vmem:[#allocation2 + $0x45] sm:$0x1]  ;;  %v268_v0 = vld [vmem:[#allocation2 + $0x54] sm:$0x1] }
  0x33   : > { %296 = vst.msk [vmem:[%s662_s15 + $0xa] sm:$0x1] %vm214_vm1, %v288_v58  ;;  %v289_v1 = vmul.f32 0.25, %v281_v59  ;;  %v283_v2 = vadd.f32 %v275_v63, %v267_v62  ;;  %v276_v3 = vld [vmem:[#allocation2 + $0x55] sm:$0x1] }
  0x34   : > { %v290_v4 = vmul.f32 0.25, %v282_v61  ;;  %v284_v5 = vadd.f32 %v276_v3, %v268_v0  ;;  %v269_v6 = vld [vmem:[#allocation2 + $0x64] sm:$0x1]  ;;  %v277_v7 = vld [vmem:[#allocation2 + $0x65] sm:$0x1] }
  0x35   : > { %297 = vst.msk [vmem:[%s662_s15 + $0x12] sm:$0x1] %vm214_vm1, %v289_v1  ;;  %v291_v8 = vmul.f32 0.25, %v283_v2  ;;  %v285_v9 = vadd.f32 %v277_v7, %v269_v6  ;;  %v270_v10 = vld [vmem:[#allocation2 + $0x74] sm:$0x1] }
  0x36   : > { %298 = vst.msk [vmem:[%s662_s15 + $0x1a] sm:$0x1] %vm214_vm1, %v290_v4  ;;  %v292_v11 = vmul.f32 0.25, %v284_v5  ;;  %v278_v12 = vld [vmem:[#allocation2 + $0x75] sm:$0x1] }
  0x37   : > { %299 = vst.msk [vmem:[%s662_s15 + $0x22] sm:$0x1] %vm214_vm1, %v291_v8  ;;  %v293_v13 = vmul.f32 0.25, %v285_v9  ;;  %v286_v14 = vadd.f32 %v278_v12, %v270_v10  ;;  %v303_v15 = vld [vmem:[#allocation2 + $0x6] sm:$0x1] }
  0x38   : > { %300 = vst.msk [vmem:[%s662_s15 + $0x2a] sm:$0x1] %vm214_vm1, %v292_v11  ;;  %v311_v16 = vld [vmem:[#allocation2 + $0x7] sm:$0x1]  ;;  %v304_v17 = vld [vmem:[#allocation2 + $0x16] sm:$0x1] }
  0x39   : > { %301 = vst.msk [vmem:[%s662_s15 + $0x32] sm:$0x1] %vm214_vm1, %v293_v13  ;;  %v294_v18 = vmul.f32 0.25, %v286_v14  ;;  %v319_v19 = vadd.f32 %v311_v16, %v303_v15  ;;  %v312_v20 = vld [vmem:[#allocation2 + $0x17] sm:$0x1] }
  0x3a   : > { %v320_v21 = vadd.f32 %v312_v20, %v304_v17  ;;  %v305_v22 = vld [vmem:[#allocation2 + $0x26] sm:$0x1]  ;;  %v313_v23 = vld [vmem:[#allocation2 + $0x27] sm:$0x1]  ;;  %v306_v24 = vld [vmem:[#allocation2 + $0x36] sm:$0x1] }
  0x3b   : > { %302 = vst.msk [vmem:[%s662_s15 + $0x3a] sm:$0x1] %vm214_vm1, %v294_v18  ;;  %v327_v25 = vmul.f32 0.25, %v319_v19  ;;  %v321_v26 = vadd.f32 %v313_v23, %v305_v22  ;;  %v314_v27 = vld [vmem:[#allocation2 + $0x37] sm:$0x1] }
  0x3c   : > { %v328_v28 = vmul.f32 0.25, %v320_v21  ;;  %v322_v29 = vadd.f32 %v314_v27, %v306_v24  ;;  %v307_v30 = vld [vmem:[#allocation2 + $0x46] sm:$0x1]  ;;  %v315_v31 = vld [vmem:[#allocation2 + $0x47] sm:$0x1] }
  0x3d   : > { %335 = vst.msk [vmem:[%s662_s15 + $0x3] sm:$0x1] %vm214_vm1, %v327_v25  ;;  %v329_v32 = vmul.f32 0.25, %v321_v26  ;;  %v323_v33 = vadd.f32 %v315_v31, %v307_v30  ;;  %v308_v34 = vld [vmem:[#allocation2 + $0x56] sm:$0x1] }
  0x3e   : > { %336 = vst.msk [vmem:[%s662_s15 + $0xb] sm:$0x1] %vm214_vm1, %v328_v28  ;;  %v330_v35 = vmul.f32 0.25, %v322_v29  ;;  %v316_v36 = vld [vmem:[#allocation2 + $0x57] sm:$0x1] }
  0x3f   : > { %337 = vst.msk [vmem:[%s662_s15 + $0x13] sm:$0x1] %vm214_vm1, %v329_v32  ;;  %v331_v37 = vmul.f32 0.25, %v323_v33  ;;  %v324_v38 = vadd.f32 %v316_v36, %v308_v34  ;;  %v309_v39 = vld [vmem:[#allocation2 + $0x66] sm:$0x1] }
  0x40   : > { %338 = vst.msk [vmem:[%s662_s15 + $0x1b] sm:$0x1] %vm214_vm1, %v330_v35  ;;  %v317_v40 = vld [vmem:[#allocation2 + $0x67] sm:$0x1]  ;;  %v310_v41 = vld [vmem:[#allocation2 + $0x76] sm:$0x1] }
  0x41   : > { %339 = vst.msk [vmem:[%s662_s15 + $0x23] sm:$0x1] %vm214_vm1, %v331_v37  ;;  %v332_v42 = vmul.f32 0.25, %v324_v38  ;;  %v325_v43 = vadd.f32 %v317_v40, %v309_v39  ;;  %v318_v44 = vld [vmem:[#allocation2 + $0x77] sm:$0x1] }
  0x42   : > { %v326_v45 = vadd.f32 %v318_v44, %v310_v41  ;;  %v343_v46 = vld [vmem:[#allocation2 + $0x8] sm:$0x1]  ;;  %v351_v47 = vld [vmem:[#allocation2 + $0x9] sm:$0x1]  ;;  %v344_v48 = vld [vmem:[#allocation2 + $0x18] sm:$0x1] }
  0x43   : > { %340 = vst.msk [vmem:[%s662_s15 + $0x2b] sm:$0x1] %vm214_vm1, %v332_v42  ;;  %v333_v49 = vmul.f32 0.25, %v325_v43  ;;  %v359_v50 = vadd.f32 %v351_v47, %v343_v46  ;;  %v352_v51 = vld [vmem:[#allocation2 + $0x19] sm:$0x1] }
  0x44   : > { %v334_v52 = vmul.f32 0.25, %v326_v45  ;;  %v360_v53 = vadd.f32 %v352_v51, %v344_v48  ;;  %v345_v54 = vld [vmem:[#allocation2 + $0x28] sm:$0x1]  ;;  %v353_v55 = vld [vmem:[#allocation2 + $0x29] sm:$0x1] }
  0x45   : > { %341 = vst.msk [vmem:[%s662_s15 + $0x33] sm:$0x1] %vm214_vm1, %v333_v49  ;;  %v367_v56 = vmul.f32 0.25, %v359_v50  ;;  %v361_v57 = vadd.f32 %v353_v55, %v345_v54  ;;  %v346_v58 = vld [vmem:[#allocation2 + $0x38] sm:$0x1] }
  0x46   : > { %342 = vst.msk [vmem:[%s662_s15 + $0x3b] sm:$0x1] %vm214_vm1, %v334_v52  ;;  %v368_v59 = vmul.f32 0.25, %v360_v53  ;;  %v354_v60 = vld [vmem:[#allocation2 + $0x39] sm:$0x1] }
  0x47   : > { %375 = vst.msk [vmem:[%s662_s15 + $0x4] sm:$0x1] %vm214_vm1, %v367_v56  ;;  %v369_v61 = vmul.f32 0.25, %v361_v57  ;;  %v362_v62 = vadd.f32 %v354_v60, %v346_v58  ;;  %v347_v63 = vld [vmem:[#allocation2 + $0x48] sm:$0x1] }
  0x48   : > { %376 = vst.msk [vmem:[%s662_s15 + $0xc] sm:$0x1] %vm214_vm1, %v368_v59  ;;  %v355_v0 = vld [vmem:[#allocation2 + $0x49] sm:$0x1]  ;;  %v348_v1 = vld [vmem:[#allocation2 + $0x58] sm:$0x1] }
  0x49   : > { %377 = vst.msk [vmem:[%s662_s15 + $0x14] sm:$0x1] %vm214_vm1, %v369_v61  ;;  %v370_v2 = vmul.f32 0.25, %v362_v62  ;;  %v363_v3 = vadd.f32 %v355_v0, %v347_v63  ;;  %v356_v4 = vld [vmem:[#allocation2 + $0x59] sm:$0x1] }
  0x4a   : > { %v364_v5 = vadd.f32 %v356_v4, %v348_v1  ;;  %v349_v6 = vld [vmem:[#allocation2 + $0x68] sm:$0x1]  ;;  %v357_v7 = vld [vmem:[#allocation2 + $0x69] sm:$0x1]  ;;  %v350_v8 = vld [vmem:[#allocation2 + $0x78] sm:$0x1] }
  0x4b   : > { %378 = vst.msk [vmem:[%s662_s15 + $0x1c] sm:$0x1] %vm214_vm1, %v370_v2  ;;  %v371_v9 = vmul.f32 0.25, %v363_v3  ;;  %v365_v10 = vadd.f32 %v357_v7, %v349_v6  ;;  %v358_v11 = vld [vmem:[#allocation2 + $0x79] sm:$0x1] }
  0x4c   : > { %v372_v12 = vmul.f32 0.25, %v364_v5  ;;  %v366_v13 = vadd.f32 %v358_v11, %v350_v8  ;;  %v383_v14 = vld [vmem:[#allocation2 + $0xa] sm:$0x1]  ;;  %v391_v15 = vld [vmem:[#allocation2 + $0xb] sm:$0x1] }
  0x4d   : > { %379 = vst.msk [vmem:[%s662_s15 + $0x24] sm:$0x1] %vm214_vm1, %v371_v9  ;;  %v373_v16 = vmul.f32 0.25, %v365_v10  ;;  %v399_v17 = vadd.f32 %v391_v15, %v383_v14  ;;  %v384_v18 = vld [vmem:[#allocation2 + $0x1a] sm:$0x1] }
  0x4e   : > { %380 = vst.msk [vmem:[%s662_s15 + $0x2c] sm:$0x1] %vm214_vm1, %v372_v12  ;;  %v374_v19 = vmul.f32 0.25, %v366_v13  ;;  %v392_v20 = vld [vmem:[#allocation2 + $0x1b] sm:$0x1] }
  0x4f   : > { %381 = vst.msk [vmem:[%s662_s15 + $0x34] sm:$0x1] %vm214_vm1, %v373_v16  ;;  %v407_v21 = vmul.f32 0.25, %v399_v17  ;;  %v400_v22 = vadd.f32 %v392_v20, %v384_v18  ;;  %v385_v23 = vld [vmem:[#allocation2 + $0x2a] sm:$0x1] }
  0x50   : > { %382 = vst.msk [vmem:[%s662_s15 + $0x3c] sm:$0x1] %vm214_vm1, %v374_v19  ;;  %v393_v24 = vld [vmem:[#allocation2 + $0x2b] sm:$0x1]  ;;  %v386_v25 = vld [vmem:[#allocation2 + $0x3a] sm:$0x1] }
  0x51   : > { %415 = vst.msk [vmem:[%s662_s15 + $0x5] sm:$0x1] %vm214_vm1, %v407_v21  ;;  %v408_v26 = vmul.f32 0.25, %v400_v22  ;;  %v401_v27 = vadd.f32 %v393_v24, %v385_v23  ;;  %v394_v28 = vld [vmem:[#allocation2 + $0x3b] sm:$0x1] }
  0x52   : > { %v402_v29 = vadd.f32 %v394_v28, %v386_v25  ;;  %v387_v30 = vld [vmem:[#allocation2 + $0x4a] sm:$0x1]  ;;  %v395_v31 = vld [vmem:[#allocation2 + $0x4b] sm:$0x1]  ;;  %v388_v32 = vld [vmem:[#allocation2 + $0x5a] sm:$0x1] }
  0x53   : > { %416 = vst.msk [vmem:[%s662_s15 + $0xd] sm:$0x1] %vm214_vm1, %v408_v26  ;;  %v409_v33 = vmul.f32 0.25, %v401_v27  ;;  %v403_v34 = vadd.f32 %v395_v31, %v387_v30  ;;  %v396_v35 = vld [vmem:[#allocation2 + $0x5b] sm:$0x1] }
  0x54   : > { %v410_v36 = vmul.f32 0.25, %v402_v29  ;;  %v404_v37 = vadd.f32 %v396_v35, %v388_v32  ;;  %v389_v38 = vld [vmem:[#allocation2 + $0x6a] sm:$0x1]  ;;  %v397_v39 = vld [vmem:[#allocation2 + $0x6b] sm:$0x1] }
  0x55   : > { %417 = vst.msk [vmem:[%s662_s15 + $0x15] sm:$0x1] %vm214_vm1, %v409_v33  ;;  %v411_v40 = vmul.f32 0.25, %v403_v34  ;;  %v405_v41 = vadd.f32 %v397_v39, %v389_v38  ;;  %v390_v42 = vld [vmem:[#allocation2 + $0x7a] sm:$0x1] }
  0x56   : > { %418 = vst.msk [vmem:[%s662_s15 + $0x1d] sm:$0x1] %vm214_vm1, %v410_v36  ;;  %v412_v43 = vmul.f32 0.25, %v404_v37  ;;  %v398_v44 = vld [vmem:[#allocation2 + $0x7b] sm:$0x1] }
  0x57   : > { %419 = vst.msk [vmem:[%s662_s15 + $0x25] sm:$0x1] %vm214_vm1, %v411_v40  ;;  %v413_v45 = vmul.f32 0.25, %v405_v41  ;;  %v406_v46 = vadd.f32 %v398_v44, %v390_v42  ;;  %v423_v47 = vld [vmem:[#allocation2 + $0xc] sm:$0x1] }
  0x58   : > { %420 = vst.msk [vmem:[%s662_s15 + $0x2d] sm:$0x1] %vm214_vm1, %v412_v43  ;;  %v431_v48 = vld [vmem:[#allocation2 + $0xd] sm:$0x1]  ;;  %v424_v49 = vld [vmem:[#allocation2 + $0x1c] sm:$0x1] }
  0x59   : > { %421 = vst.msk [vmem:[%s662_s15 + $0x35] sm:$0x1] %vm214_vm1, %v413_v45  ;;  %v414_v50 = vmul.f32 0.25, %v406_v46  ;;  %v439_v51 = vadd.f32 %v431_v48, %v423_v47  ;;  %v432_v52 = vld [vmem:[#allocation2 + $0x1d] sm:$0x1] }
  0x5a   : > { %v440_v53 = vadd.f32 %v432_v52, %v424_v49  ;;  %v425_v54 = vld [vmem:[#allocation2 + $0x2c] sm:$0x1]  ;;  %v433_v55 = vld [vmem:[#allocation2 + $0x2d] sm:$0x1]  ;;  %v426_v56 = vld [vmem:[#allocation2 + $0x3c] sm:$0x1] }
  0x5b   : > { %422 = vst.msk [vmem:[%s662_s15 + $0x3d] sm:$0x1] %vm214_vm1, %v414_v50  ;;  %v447_v57 = vmul.f32 0.25, %v439_v51  ;;  %v441_v58 = vadd.f32 %v433_v55, %v425_v54  ;;  %v434_v59 = vld [vmem:[#allocation2 + $0x3d] sm:$0x1] }
  0x5c   : > { %v448_v60 = vmul.f32 0.25, %v440_v53  ;;  %v442_v61 = vadd.f32 %v434_v59, %v426_v56  ;;  %v427_v62 = vld [vmem:[#allocation2 + $0x4c] sm:$0x1]  ;;  %v435_v63 = vld [vmem:[#allocation2 + $0x4d] sm:$0x1] }
  0x5d   : > { %455 = vst.msk [vmem:[%s662_s15 + $0x6] sm:$0x1] %vm214_vm1, %v447_v57  ;;  %v449_v0 = vmul.f32 0.25, %v441_v58  ;;  %v443_v1 = vadd.f32 %v435_v63, %v427_v62  ;;  %v428_v2 = vld [vmem:[#allocation2 + $0x5c] sm:$0x1] }
  0x5e   : > { %456 = vst.msk [vmem:[%s662_s15 + $0xe] sm:$0x1] %vm214_vm1, %v448_v60  ;;  %v450_v3 = vmul.f32 0.25, %v442_v61  ;;  %v436_v4 = vld [vmem:[#allocation2 + $0x5d] sm:$0x1] }
  0x5f   : > { %457 = vst.msk [vmem:[%s662_s15 + $0x16] sm:$0x1] %vm214_vm1, %v449_v0  ;;  %v451_v5 = vmul.f32 0.25, %v443_v1  ;;  %v444_v6 = vadd.f32 %v436_v4, %v428_v2  ;;  %v429_v7 = vld [vmem:[#allocation2 + $0x6c] sm:$0x1] }
  0x60   : > { %458 = vst.msk [vmem:[%s662_s15 + $0x1e] sm:$0x1] %vm214_vm1, %v450_v3  ;;  %v437_v8 = vld [vmem:[#allocation2 + $0x6d] sm:$0x1]  ;;  %v430_v9 = vld [vmem:[#allocation2 + $0x7c] sm:$0x1] }
  0x61   : > { %459 = vst.msk [vmem:[%s662_s15 + $0x26] sm:$0x1] %vm214_vm1, %v451_v5  ;;  %v452_v10 = vmul.f32 0.25, %v444_v6  ;;  %v445_v11 = vadd.f32 %v437_v8, %v429_v7  ;;  %v438_v12 = vld [vmem:[#allocation2 + $0x7d] sm:$0x1] }
  0x62   : > { %v446_v13 = vadd.f32 %v438_v12, %v430_v9  ;;  %v463_v14 = vld [vmem:[#allocation2 + $0xe] sm:$0x1]  ;;  %v471_v15 = vld [vmem:[#allocation2 + $0xf] sm:$0x1]  ;;  %v464_v16 = vld [vmem:[#allocation2 + $0x1e] sm:$0x1] }
  0x63   : > { %460 = vst.msk [vmem:[%s662_s15 + $0x2e] sm:$0x1] %vm214_vm1, %v452_v10  ;;  %v453_v17 = vmul.f32 0.25, %v445_v11  ;;  %v479_v18 = vadd.f32 %v471_v15, %v463_v14  ;;  %v472_v19 = vld [vmem:[#allocation2 + $0x1f] sm:$0x1] }
  0x64   : > { %v454_v20 = vmul.f32 0.25, %v446_v13  ;;  %v480_v21 = vadd.f32 %v472_v19, %v464_v16  ;;  %v465_v22 = vld [vmem:[#allocation2 + $0x2e] sm:$0x1]  ;;  %v473_v23 = vld [vmem:[#allocation2 + $0x2f] sm:$0x1] }
  0x65   : > { %461 = vst.msk [vmem:[%s662_s15 + $0x36] sm:$0x1] %vm214_vm1, %v453_v17  ;;  %v487_v24 = vmul.f32 0.25, %v479_v18  ;;  %v481_v25 = vadd.f32 %v473_v23, %v465_v22  ;;  %v466_v26 = vld [vmem:[#allocation2 + $0x3e] sm:$0x1] }
  0x66   : > { %462 = vst.msk [vmem:[%s662_s15 + $0x3e] sm:$0x1] %vm214_vm1, %v454_v20  ;;  %v488_v27 = vmul.f32 0.25, %v480_v21  ;;  %v474_v28 = vld [vmem:[#allocation2 + $0x3f] sm:$0x1] }
  0x67   : > { %495 = vst.msk [vmem:[%s662_s15 + $0x7] sm:$0x1] %vm214_vm1, %v487_v24  ;;  %v489_v29 = vmul.f32 0.25, %v481_v25  ;;  %v482_v30 = vadd.f32 %v474_v28, %v466_v26  ;;  %v467_v31 = vld [vmem:[#allocation2 + $0x4e] sm:$0x1] }
  0x68   : > { %496 = vst.msk [vmem:[%s662_s15 + $0xf] sm:$0x1] %vm214_vm1, %v488_v27  ;;  %v475_v32 = vld [vmem:[#allocation2 + $0x4f] sm:$0x1]  ;;  %v468_v33 = vld [vmem:[#allocation2 + $0x5e] sm:$0x1] }
  0x69   : > { %497 = vst.msk [vmem:[%s662_s15 + $0x17] sm:$0x1] %vm214_vm1, %v489_v29  ;;  %v490_v34 = vmul.f32 0.25, %v482_v30  ;;  %v483_v35 = vadd.f32 %v475_v32, %v467_v31  ;;  %v476_v36 = vld [vmem:[#allocation2 + $0x5f] sm:$0x1] }
  0x6a   : > { %v484_v37 = vadd.f32 %v476_v36, %v468_v33  ;;  %v469_v38 = vld [vmem:[#allocation2 + $0x6e] sm:$0x1]  ;;  %v477_v39 = vld [vmem:[#allocation2 + $0x6f] sm:$0x1]  ;;  %v470_v40 = vld [vmem:[#allocation2 + $0x7e] sm:$0x1] }
  0x6b   : > { %498 = vst.msk [vmem:[%s662_s15 + $0x1f] sm:$0x1] %vm214_vm1, %v490_v34  ;;  %v491_v41 = vmul.f32 0.25, %v483_v35  ;;  %v485_v42 = vadd.f32 %v477_v39, %v469_v38  ;;  %v478_v43 = vld [vmem:[#allocation2 + $0x7f] sm:$0x1] }
  0x6c   : > { %v492_v44 = vmul.f32 0.25, %v484_v37  ;;  %v486_v45 = vadd.f32 %v478_v43, %v470_v40 }
  0x6d   : > { %499 = vst.msk [vmem:[%s662_s15 + $0x27] sm:$0x1] %vm214_vm1, %v491_v41  ;;  %v493_v46 = vmul.f32 0.25, %v485_v42 }
  0x6e   : > { %500 = vst.msk [vmem:[%s662_s15 + $0x2f] sm:$0x1] %vm214_vm1, %v492_v44  ;;  %v494_v47 = vmul.f32 0.25, %v486_v45 }
  0x6f   : > { %501 = vst.msk [vmem:[%s662_s15 + $0x37] sm:$0x1] %vm214_vm1, %v493_v46 }
  0x70   : > { %502 = vst.msk [vmem:[%s662_s15 + $0x3f] sm:$0x1] %vm214_vm1, %v494_v47 }
  0x71 PF: > { %s11_s6 = sadd.s32 1, %s585_s6  }
  0x72   : > { %p8_p4 = scmp.ge.s32.totalorder %s11_s6, 4  }
  0x74   :  { %10 = sbr.rel (!%p8_p4) target bundleno = 1 (0x1), region = 54 }

</bundles_post_ra>
